<compile_context>
chip_gen: v6e
topology: v6e:2x2x1
jax: 0.10.0
libtpu: 0.0.40
codegen_flags: <defaults>
</compile_context>

<pallas_src>
import jax
import jax.numpy as jnp
import numpy as np
from jax.experimental import pallas as pl
from jax.experimental.pallas import tpu as pltpu


# ----------------------------- Pallas kernels (hot path) -----------------------------
def _gemm_bias_kernel(a_ref, w_ref, b_ref, o_ref):
    # Single contraction tile: weights fully VMEM-resident, no accumulator scratch.
    # a: (tm, K)  gathered/packed neighbor features (compute dtype)
    # w: (K, W)   (block-diagonal) flattened conv weights (compute dtype, resident)
    # b: (1, W)   packed bias (f32, resident)
    # o: (tm, W)  lane-dense output (input dtype)
    o_ref[...] = (jnp.dot(a_ref[...], w_ref[...], preferred_element_type=jnp.float32)
                  + b_ref[...]).astype(o_ref.dtype)


def _gemm_bias_acc_kernel(a_ref, w_ref, b_ref, o_ref, acc_ref):
    # Split contraction axis: f32 VMEM accumulator resident across the k grid axis.
    k = pl.program_id(1)

    @pl.when(k == 0)
    def _init():
        acc_ref[...] = jnp.zeros_like(acc_ref)

    acc_ref[...] += jnp.dot(a_ref[...], w_ref[...],
                            preferred_element_type=jnp.float32)

    @pl.when(k == pl.num_programs(1) - 1)
    def _finalize():
        o_ref[...] = (acc_ref[...] + b_ref[...]).astype(o_ref.dtype)


# ----------------------------- VMEM budgeting (generation + padding aware) -----------------------------
def _vmem_capacity_bytes():
    try:
        return int(pltpu.get_tpu_info().vmem_capacity_bytes)
    except Exception:
        return 64 * 1024 * 1024  # conservative v7x-sized fallback (safe on all gens)


def _padded_tile_bytes(rows, cols, itemsize):
    """VMEM footprint of a (rows, cols) tile including (sublane, lane) layout padding."""
    sub = 8 * (4 // itemsize)                 # 8 sublanes for 4-byte, 16 for 2-byte dtypes
    r = -(-rows // sub) * sub
    c = -(-cols // 128) * 128
    return r * c * itemsize


def _pick_tiles(packed_rows, k_dim, out_w, a_itemsize, o_itemsize, budget, tm=None):
    """Pick (row_tile, k_tile, vmem_need) in packed-row units.

    Preference: the largest row tile with fully VMEM-resident weights (single k tile);
    the contraction axis is split only if resident weights do not fit even at the
    minimum row tile.  Footprints use padded tile sizes and double-buffered operands.
    """
    def footprint(tm2, tk):
        n_k = -(-k_dim // tk)
        need = (2 * _padded_tile_bytes(tm2, tk, a_itemsize)        # A tile (double-buffered)
                + 2 * _padded_tile_bytes(tk, out_w, a_itemsize)    # W tile (double-buffered)
                + 2 * _padded_tile_bytes(tm2, out_w, o_itemsize)   # out tile (double-buffered)
                + _padded_tile_bytes(1, out_w, 4))                 # bias
        if n_k > 1:
            need += _padded_tile_bytes(tm2, out_w, 4)              # f32 accumulator scratch
        return need

    data_cap = -(-packed_rows // 8) * 8
    if tm is not None:
        cap = min(data_cap, max(8, (int(tm) // 8) * 8))
        candidates = (cap,)
    else:
        # keep >= 4 row tiles when the data allows (v7x shards the "parallel" row axis
        # over its 2 TensorCores), but never shrink a tile below 64 packed rows for it.
        par_cap = max(64, ((packed_rows // 4) // 8) * 8) if packed_rows >= 64 else data_cap
        cap = min(data_cap, par_cap)
        candidates = (1024, 512, 256, 128, 64, 32, 16, 8)

    best = None
    for cand in candidates:
        tm2 = max(8, min(cand, cap))
        need = footprint(tm2, k_dim)            # resident weights, single contraction tile
        if need <= budget:
            return tm2, k_dim, need
        best = (tm2, k_dim, need)

    # Resident weights do not fit even at the minimum row tile: split the contraction
    # axis with a tk that is a multiple of 128 and divides k_dim exactly (no ragged
    # contraction block is ever read).
    tm2 = 8 if tm is None else max(8, min((int(tm) // 8) * 8, data_cap))
    if k_dim % 128 == 0:
        for tk in range(min(k_dim - 128, 8 * 1024), 127, -128):
            if k_dim % tk == 0 and footprint(tm2, tk) <= budget:
                return tm2, tk, footprint(tm2, tk)
    return best


# ----------------------------- wrapper -----------------------------
def submconv3d_pallas(feats, coords, weight, bias, spatial_shape, batch_size,
                      dilation=1, tm=None, compute_in_bf16=False):
    """Submanifold sparse 3D convolution.

    feats:  (N, C_in) float array
    coords: (N, 4) int32 [batch, z, y, x] (unique active sites, as spconv assumes)
    weight: (ks, ks, ks, C_in, C_out)
    bias:   (C_out,)
    compute_in_bf16: optional bf16 A/W streams for f32 models (f32 MXU accumulation);
                     off by default to honour the module's f32-compute contract.
    """
    N, C_in = feats.shape
    ks = weight.shape[0]
    assert ks % 2 == 1, "SubMConv3d path assumes an odd kernel size (centered offsets)"
    C_out = weight.shape[-1]
    K3 = ks * ks * ks
    K = K3 * C_in
    D, H, W = spatial_shape
    in_dtype = feats.dtype

    if np.dtype(in_dtype) == np.dtype(jnp.bfloat16) or compute_in_bf16:
        compute_dtype = jnp.bfloat16
    else:
        compute_dtype = jnp.float32
    a_itemsize = np.dtype(compute_dtype).itemsize
    o_itemsize = np.dtype(in_dtype).itemsize

    cap = _vmem_capacity_bytes()
    budget = int(cap * 0.70)

    # ---- lane packing: G consecutive output rows share one 128-wide lane slab ----
    G = 128 // C_out if (C_out < 128 and 128 % C_out == 0) else 1
    if G > 1 and 2 * _padded_tile_bytes(G * K, G * C_out, a_itemsize) > budget // 3:
        G = 1  # block-diagonal weights too large to keep resident; fall back to thin output
    out_w = G * C_out
    k_dim = G * K

    packed_rows = -(-N // G)
    tm2, tk, vmem_need = _pick_tiles(packed_rows, k_dim, out_w,
                                     a_itemsize, o_itemsize, budget, tm=tm)
    if vmem_need > int(cap * 0.9):
        raise ValueError(
            f"SubMConv3d tiling needs ~{vmem_need >> 20} MiB VMEM even at the minimum "
            f"row tile; this exceeds the chip's VMEM capacity ({cap >> 20} MiB).")
    num_row_tiles = -(-packed_rows // tm2)
    packed_rows_pad = num_row_tiles * tm2
    n_pad = packed_rows_pad * G
    n_k_tiles = k_dim // tk

    # ---- glue: neighbor index map via dense voxel lookup (index plumbing, not compute) ----
    # NOTE: duplicate active coordinates would silently overwrite each other here;
    #       spconv assumes unique active sites and so do we.
    vol = jnp.full((batch_size, D, H, W), -1, jnp.int32)
    vol = vol.at[coords[:, 0], coords[:, 1], coords[:, 2], coords[:, 3]].set(
        jnp.arange(N, dtype=jnp.int32))

    half = (ks - 1) // 2
    rng = jnp.arange(ks, dtype=jnp.int32) - half
    offs = jnp.stack(jnp.meshgrid(rng, rng, rng, indexing="ij"), axis=-1).reshape(-1, 3)
    offs = offs * dilation                                              # (K3, 3)

    nbr = coords[:, None, 1:] + offs[None, :, :]                        # (N, K3, 3)
    lims = jnp.array([D, H, W], jnp.int32)
    in_bounds = jnp.all((nbr >= 0) & (nbr < lims), axis=-1)             # (N, K3)
    nbr_c = jnp.clip(nbr, 0, lims - 1)
    b_idx = jnp.broadcast_to(coords[:, None, 0], (N, K3))
    nbr_idx = vol[b_idx, nbr_c[..., 0], nbr_c[..., 1], nbr_c[..., 2]]   # (N, K3), -1 if empty
    nbr_idx = jnp.where(in_bounds, nbr_idx, -1)

    # pad the (tiny) int32 index array to the tiled row count BEFORE the gather, so the
    # dominant im2col stream is built once at its final padded size (no jnp.pad re-copy).
    if n_pad != N:
        nbr_idx = jnp.pad(nbr_idx, ((0, n_pad - N), (0, 0)), constant_values=-1)

    # im2col gather (XLA-side, see TODO at top), built directly in the compute dtype.
    feats_pad = jnp.concatenate(
        [feats.astype(compute_dtype), jnp.zeros((1, C_in), compute_dtype)], axis=0)
    gathered = feats_pad[jnp.where(nbr_idx < 0, N, nbr_idx)]            # (n_pad, K3, C_in)
    # contiguous reshape => free: packs G consecutive rows into one lane-dense GEMM row
    A = gathered.reshape(packed_rows_pad, k_dim)

    Wmat = weight.astype(compute_dtype).reshape(K, C_out)
    if G > 1:
        # block-diagonal (G*K, G*C_out): row-group g only touches output columns of group g
        Wmat = jnp.kron(jnp.eye(G, dtype=compute_dtype), Wmat)
    bvec = jnp.tile(bias.astype(jnp.float32), G).reshape(1, out_w)

    vmem_limit = int(min(vmem_need + (16 << 20), int(cap * 0.9)))

    if n_k_tiles == 1:
        out = pl.pallas_call(
            _gemm_bias_kernel,
            out_shape=jax.ShapeDtypeStruct((packed_rows_pad, out_w), in_dtype),
            grid_spec=pltpu.PrefetchScalarGridSpec(
                num_scalar_prefetch=0,
                grid=(num_row_tiles,),
                in_specs=[
                    pl.BlockSpec((tm2, k_dim), lambda i: (i, 0)),      # im2col rows (streamed)
                    pl.BlockSpec((k_dim, out_w), lambda i: (0, 0)),    # weights (VMEM-resident)
                    pl.BlockSpec((1, out_w), lambda i: (0, 0)),        # bias (VMEM-resident)
                ],
                out_specs=pl.BlockSpec((tm2, out_w), lambda i: (i, 0)),
            ),
            compiler_params=pltpu.CompilerParams(
                dimension_semantics=("parallel",),
                vmem_limit_bytes=vmem_limit,
            ),
        )(A, Wmat, bvec)
    else:
        out = pl.pallas_call(
            _gemm_bias_acc_kernel,
            out_shape=jax.ShapeDtypeStruct((packed_rows_pad, out_w), in_dtype),
            grid_spec=pltpu.PrefetchScalarGridSpec(
                num_scalar_prefetch=0,
                grid=(num_row_tiles, n_k_tiles),
                in_specs=[
                    pl.BlockSpec((tm2, tk), lambda i, k: (i, k)),
                    pl.BlockSpec((tk, out_w), lambda i, k: (k, 0)),
                    pl.BlockSpec((1, out_w), lambda i, k: (0, 0)),
                ],
                out_specs=pl.BlockSpec((tm2, out_w), lambda i, k: (i, 0)),
                scratch_shapes=[pltpu.VMEM((tm2, out_w), jnp.float32)],
            ),
            compiler_params=pltpu.CompilerParams(
                dimension_semantics=("parallel", "arbitrary"),
                vmem_limit_bytes=vmem_limit,
            ),
        )(A, Wmat, bvec)

    # unpack the lane slab (contiguous reshape, free) and drop the row padding
    return out.reshape(n_pad, C_out)[:N]


# ----------------------------- dense reference (validation only) -----------------------------
def _dense_reference(feats, coords, weight, bias, spatial_shape, batch_size, dilation=1):
    N, C_in = feats.shape
    ks = weight.shape[0]
    D, H, W = spatial_shape
    dense = jnp.zeros((batch_size, C_in, D, H, W), jnp.float32)
    dense = dense.at[coords[:, 0], :, coords[:, 1], coords[:, 2], coords[:, 3]].set(
        feats.astype(jnp.float32))
    # weight (kz,ky,kx,Cin,Cout) -> OIDHW (cross-correlation, same as PyTorch/spconv)
    w_oidhw = jnp.transpose(weight.astype(jnp.float32), (4, 3, 0, 1, 2))
    half = (ks - 1) // 2 * dilation
    y = jax.lax.conv_general_dilated(
        dense, w_oidhw,
        window_strides=(1, 1, 1),
        padding=[(half, half)] * 3,
        rhs_dilation=(dilation,) * 3,
        dimension_numbers=("NCDHW", "OIDHW", "NCDHW"),
    )
    y = y + bias.astype(jnp.float32)[None, :, None, None, None]
    # sample at active sites only (submanifold output)
    return y[coords[:, 0], :, coords[:, 1], coords[:, 2], coords[:, 3]]


# ----------------------------- demo -----------------------------
if __name__ == "__main__":
    key = jax.random.PRNGKey(0)
    k_w, k_b, k_f, k_c0, k_c1 = jax.random.split(key, 5)

    # module config: SparseConv3d(in_channels=4, out_channels=8, kernel_size=3)  (SubMConv3d path)
    in_channels, out_channels, kernel_size = 4, 8, 3
    batch_size, spatial = 2, (16, 16, 16)
    n_per_batch = 96
    N = batch_size * n_per_batch

    # deterministic "kaiming-like" init (synthetic weights, not a checkpoint)
    fan_in = in_channels * kernel_size ** 3
    bound = 1.0 / np.sqrt(fan_in)
    weight = jax.random.uniform(
        k_w, (kernel_size, kernel_size, kernel_size, in_channels, out_channels),
        jnp.float32, -bound, bound)
    bias = jax.random.uniform(k_b, (out_channels,), jnp.float32, -bound, bound)

    # unique active voxel coordinates per batch
    D, H, W = spatial
    coords_list = []
    for b, kb in enumerate([k_c0, k_c1]):
        flat = jax.random.permutation(kb, D * H * W)[:n_per_batch]
        z = flat // (H * W)
        y = (flat // W) % H
        x = flat % W
        bcol = jnp.full((n_per_batch,), b, jnp.int32)
        coords_list.append(jnp.stack([bcol, z, y, x], axis=-1).astype(jnp.int32))
    coords = jnp.concatenate(coords_list, axis=0)                      # (N, 4)

    feats = jax.random.normal(k_f, (N, in_channels), jnp.float32)      # (N, C_in)

    out = submconv3d_pallas(feats, coords, weight, bias, spatial, batch_size)
    out = jax.block_until_ready(out)
    assert out.shape == (N, out_channels) and out.dtype == feats.dtype

    ref = _dense_reference(feats, coords, weight, bias, spatial, batch_size)
    np.testing.assert_allclose(np.asarray(out, np.float32), np.asarray(ref), rtol=1e-2, atol=1e-2)

    print("KERNEL_OK")
</pallas_src>

<mosaic_0001>
module attributes {stable_mosaic.version = 11 : i64} {
  func.func @_gemm_bias_kernel(%arg0: i32, %arg1: memref<16x1728xf32, #tpu.memory_space<vmem>>, %arg2: memref<1728x128xf32, #tpu.memory_space<vmem>>, %arg3: memref<1x128xf32, #tpu.memory_space<vmem>>, %arg4: memref<16x128xf32, #tpu.memory_space<vmem>>) attributes {dimension_semantics = [#tpu.dimension_semantics<parallel>], iteration_bounds = array<i64: 1>, scalar_prefetch = 0 : i64, scratch_operands = 0 : i64, tpu.core_type = #tpu.core_type<tc>, window_params = [{transform_indices = @transform_0, window_bounds = array<i64: 16, 1728>}, {pipeline_mode = #tpu.pipeline_mode<synchronous>, transform_indices = @transform_1, window_bounds = array<i64: 1728, 128>}, {pipeline_mode = #tpu.pipeline_mode<synchronous>, transform_indices = @transform_2, window_bounds = array<i64: 1, 128>}, {transform_indices = @transform_3, window_bounds = array<i64: 16, 128>}]} {
    %c0 = arith.constant 0 : index
    %c0_0 = arith.constant 0 : index
    %0 = vector.load %arg1[%c0, %c0_0] : memref<16x1728xf32, #tpu.memory_space<vmem>>, vector<16x1728xf32>
    %c0_1 = arith.constant 0 : index
    %c0_2 = arith.constant 0 : index
    %1 = vector.load %arg2[%c0_1, %c0_2] : memref<1728x128xf32, #tpu.memory_space<vmem>>, vector<1728x128xf32>
    %cst = arith.constant dense<0.000000e+00> : vector<16x128xf32>
    %2 = tpu.matmul %0, %1, %cst {dimension_numbers = #tpu.dot_dimension_numbers<[1], [0], [0], [1], [0, 0, 1, 1], [], []>} : vector<16x1728xf32>, vector<1728x128xf32>, vector<16x128xf32> -> vector<16x128xf32>
    %c0_3 = arith.constant 0 : index
    %c0_4 = arith.constant 0 : index
    %3 = vector.load %arg3[%c0_3, %c0_4] : memref<1x128xf32, #tpu.memory_space<vmem>>, vector<1x128xf32>
    %4 = vector.broadcast %3 : vector<1x128xf32> to vector<16x128xf32>
    %5 = arith.addf %2, %4 : vector<16x128xf32>
    %c0_5 = arith.constant 0 : index
    %c0_6 = arith.constant 0 : index
    %6 = vector.load %arg4[%c0_5, %c0_6] : memref<16x128xf32, #tpu.memory_space<vmem>>, vector<16x128xf32>
    tpu.vector_store %arg4[%c0_5, %c0_6], %5 {strides = array<i32>} : memref<16x128xf32, #tpu.memory_space<vmem>>, vector<16x128xf32>,
    return
  }
  func.func @transform_0(%arg0: i32) -> (i32, i32) {
    %c0_i32 = arith.constant 0 : i32
    %c0_i32_0 = arith.constant 0 : i32
    return %arg0, %c0_i32 : i32, i32
  }
  func.func @transform_1(%arg0: i32) -> (i32, i32) {
    %c0_i32 = arith.constant 0 : i32
    %c0_i32_0 = arith.constant 0 : i32
    %c0_i32_1 = arith.constant 0 : i32
    return %c0_i32, %c0_i32_0 : i32, i32
  }
  func.func @transform_2(%arg0: i32) -> (i32, i32) {
    %c0_i32 = arith.constant 0 : i32
    %c0_i32_0 = arith.constant 0 : i32
    %c0_i32_1 = arith.constant 0 : i32
    return %c0_i32, %c0_i32_0 : i32, i32
  }
  func.func @transform_3(%arg0: i32) -> (i32, i32) {
    %c0_i32 = arith.constant 0 : i32
    %c0_i32_0 = arith.constant 0 : i32
    return %arg0, %c0_i32 : i32, i32
  }
}

</mosaic_0001>

<bundles_post_ra>
// kernel: tpu_custom_call.1
= control target key start
LH: loop header
LB: loop body
LE: loop exit
PB: predicated region body
PF: predicated region fallthrough
CT: control target
= control target key end

     0   :  { %8 = vsyncpa [#allocation3], 0  ;;  %s1221_s0 = inlined_call_operand.hbm [shape: f32[16,1728], index: 0, kind: input, shape index: {}]   ;;  %s1222_s1 = inlined_call_operand.hbm [shape: f32[1728,128], index: 1, kind: input, shape index: {}]   ;;  %s1223_s2 = inlined_call_operand.vmem [shape: f32[1,128], index: 2, kind: input, shape index: {}]   ;;  %s1224_s3 = inlined_call_operand.hbm [shape: f32[16,128], index: 3, kind: output, shape index: {}]  }
   0x1   :  { %9 = vsyncpa [#allocation6], 0 }
   0x2   :  { %10 = vsyncpa [#allocation4], 0  ;;  %s1151_s12 = smov [#allocation2]  }
   0x3   :  { %s16_s13 = sshll.u32 %s1151_s12, 4  ;;  %s17_s13 = int_to_ptr.vmem [resolvable:$true] %s16_s13 }
   0x4   :  { %s1093_s14 = scalar_lea.vmem %s17_s13, 3584  ;;  %p1098_p1 = scmp.lt.s32.totalorder %s17_s13, %s17_s13 }
   0x5   :  { %p1094_p0 = scmp.ne.s32.totalorder %s17_s13, %s1093_s14  ;;  %p1099_p2 = scmp.lt.s32.totalorder %s1093_s14, %s1093_s14 }
   0x7   :  { %p1100_p3 = por %p1099_p2, %p1098_p1 }
   0x9   :  { %p1101_p4 = pnand %p1100_p3, %p1094_p0 }
   0xb   :  { %1104 = shalt.err (!%p1101_p4)
}
   0xc   :  { %s1152_s15 = smov 1792   ;;  %s1153_s16 = smov 112  }
   0xd   :  { %22 = dma.hbm_to_vmem [thread:$0]  %s1221_s0, 3584, %s17_s13, [#allocation3], %s1152_s15, %s1152_s15, %s1153_s16  }
   0xe   :  { %s1154_s19 = smov [#allocation5]  }
   0xf   :  { %s28_s20 = sshll.u32 %s1154_s19, 4  ;;  %s29_s20 = int_to_ptr.vmem [resolvable:$true] %s28_s20 }
  0x10   :  { %s1113_s21 = scalar_lea.vmem %s29_s20, 27648  ;;  %p1118_p6 = scmp.lt.s32.totalorder %s29_s20, %s29_s20 }
  0x11   :  { %p1114_p5 = scmp.ne.s32.totalorder %s29_s20, %s1113_s21  ;;  %p1119_p7 = scmp.lt.s32.totalorder %s1113_s21, %s1113_s21 }
  0x13   :  { %p1120_p8 = por %p1119_p7, %p1118_p6 }
  0x15   :  { %p1121_p9 = pnand %p1120_p8, %p1114_p5 }
  0x17   :  { %1124 = shalt.err (!%p1121_p9)
}
  0x18   :  { %s1155_s22 = smov 128   ;;  %s1156_s23 = smov 8  }
  0x19   :  { %34 = dma.hbm_to_vmem [thread:$0]  %s1222_s1, 27648, %s29_s20, [#allocation6], %s1155_s22, %s1155_s22, %s1156_s23  }
  0x1a   :  { %1145 = dma.done.wait [#allocation3], 3584  }
  0x1b   :  { %1146 = vsyncadd [#allocation3], 4294963712 }
  0x1c   :  { %1147 = dma.done.wait [#allocation6], 27648  }
  0x1d   :  { %1148 = vsyncadd [#allocation6], 4294939648  ;;  %v102_v0 = vld [vmem:[#allocation5 + $0xf8] sm:$0xff]  ;;  %v101_v2 = vld [vmem:[#allocation5 + $0xf0] sm:$0xff]  ;;  %vm294_vm0 = vcmask 523264  }
  0x1e   :  { %v86_v1 = vld [vmem:[#allocation5 + $0x78] sm:$0xff]  ;;  %849 = vmatprep.subr.mxu1 %v102_v0  ;;  %v85_v3 = vld [vmem:[#allocation5 + $0x70] sm:$0xff]  ;;  %v100_v4 = vld [vmem:[#allocation5 + $0xe8] sm:$0xff] }
  0x1f   :  { %850 = vmatpush3.msra.mxu1 %v86_v1  ;;  %v84_v5 = vld [vmem:[#allocation5 + $0x68] sm:$0xff]  ;;  %v99_v6 = vld [vmem:[#allocation5 + $0xe0] sm:$0xff]  ;;  %v98_v8 = vld [vmem:[#allocation5 + $0xd8] sm:$0xff] }
  0x20   :  { %851 = vmatprep.subr.mxu1 %v101_v2  ;;  %v83_v7 = vld [vmem:[#allocation5 + $0x60] sm:$0xff]  ;;  %v82_v9 = vld [vmem:[#allocation5 + $0x58] sm:$0xff]  ;;  %v97_v12 = vld [vmem:[#allocation5 + $0xd0] sm:$0xff] }
  0x21   :  { %852 = vmatpush3.msra.mxu1 %v85_v3  ;;  %v166_v10 = vld [vmem:[#allocation5 + $0x2f8] sm:$0xff]  ;;  %v165_v13 = vld [vmem:[#allocation5 + $0x2f0] sm:$0xff]  ;;  %v164_v16 = vld [vmem:[#allocation5 + $0x2e8] sm:$0xff] }
  0x22   :  { %853 = vmatprep.subr.mxu1 %v100_v4  ;;  %v150_v11 = vld [vmem:[#allocation5 + $0x278] sm:$0xff]  ;;  %925 = vmatprep.subr.mxu0 %v166_v10  ;;  %v81_v14 = vld [vmem:[#allocation5 + $0x50] sm:$0xff]  ;;  %v96_v17 = vld [vmem:[#allocation5 + $0xc8] sm:$0xff] }
  0x23   :  { %854 = vmatpush3.msra.mxu1 %v84_v5  ;;  %926 = vmatpush3.msra.mxu0 %v150_v11  ;;  %v149_v15 = vld [vmem:[#allocation5 + $0x270] sm:$0xff]  ;;  %v148_v18 = vld [vmem:[#allocation5 + $0x268] sm:$0xff]  ;;  %v163_v20 = vld [vmem:[#allocation5 + $0x2e0] sm:$0xff] }
  0x24   :  { %855 = vmatprep.subr.mxu1 %v99_v6  ;;  %927 = vmatprep.subr.mxu0 %v165_v13  ;;  %v80_v19 = vld [vmem:[#allocation5 + $0x48] sm:$0xff]  ;;  %v95_v21 = vld [vmem:[#allocation5 + $0xc0] sm:$0xff]  ;;  %v162_v24 = vld [vmem:[#allocation5 + $0x2d8] sm:$0xff] }
  0x25   :  { %856 = vmatpush3.msra.mxu1 %v83_v7  ;;  %928 = vmatpush3.msra.mxu0 %v149_v15  ;;  %v147_v22 = vld [vmem:[#allocation5 + $0x260] sm:$0xff]  ;;  %v94_v25 = vld [vmem:[#allocation5 + $0xb8] sm:$0xff]  ;;  %v161_v28 = vld [vmem:[#allocation5 + $0x2d0] sm:$0xff] }
  0x26   :  { %857 = vmatprep.subr.mxu1 %v98_v8  ;;  %929 = vmatprep.subr.mxu0 %v164_v16  ;;  %v79_v23 = vld [vmem:[#allocation5 + $0x40] sm:$0xff]  ;;  %v146_v26 = vld [vmem:[#allocation5 + $0x258] sm:$0xff]  ;;  %v93_v29 = vld [vmem:[#allocation5 + $0xb0] sm:$0xff] }
  0x27   :  { %858 = vmatpush3.msra.mxu1 %v82_v9  ;;  %930 = vmatpush3.msra.mxu0 %v148_v18  ;;  %v78_v27 = vld [vmem:[#allocation5 + $0x38] sm:$0xff]  ;;  %v44_v30 = vld [vmem:[#allocation2 + $0x8] sm:$0xff]  ;;  %v77_v31 = vld [vmem:[#allocation5 + $0x30] sm:$0xff] }
  0x28   :  { %859 = vmatprep.subr.mxu1 %v97_v12  ;;  %931 = vmatprep.subr.mxu0 %v163_v20  ;;  %v145_v32 = vld [vmem:[#allocation5 + $0x250] sm:$0xff]  ;;  %v92_v33 = vld [vmem:[#allocation5 + $0xa8] sm:$0xff]  ;;  %v91_v37 = vld [vmem:[#allocation5 + $0xa0] sm:$0xff] }
  0x29   :  { %860 = vmatpush3.msra.mxu1 %v81_v14  ;;  %932 = vmatpush3.msra.mxu0 %v147_v22  ;;  %v160_v34 = vld [vmem:[#allocation5 + $0x2c8] sm:$0xff]  ;;  %v159_v38 = vld [vmem:[#allocation5 + $0x2c0] sm:$0xff]  ;;  %v90_v41 = vld [vmem:[#allocation5 + $0x98] sm:$0xff] }
  0x2a   :  { %861 = vmatprep.subr.mxu1 %v96_v17  ;;  %933 = vmatprep.subr.mxu0 %v162_v24  ;;  %v76_v35 = vld [vmem:[#allocation5 + $0x28] sm:$0xff]  ;;  %v75_v39 = vld [vmem:[#allocation5 + $0x20] sm:$0xff]  ;;  %v158_v42 = vld [vmem:[#allocation5 + $0x2b8] sm:$0xff] }
  0x2b   :  { %862 = vmatpush3.msra.mxu1 %v80_v19  ;;  %934 = vmatpush3.msra.mxu0 %v146_v26  ;;  %v144_v36 = vld [vmem:[#allocation5 + $0x248] sm:$0xff]  ;;  %v143_v40 = vld [vmem:[#allocation5 + $0x240] sm:$0xff]  ;;  %v74_v43 = vld [vmem:[#allocation5 + $0x18] sm:$0xff] }
  0x2c   :  { %863 = vmatprep.subr.mxu1 %v95_v21  ;;  %935 = vmatprep.subr.mxu0 %v161_v28  ;;  %v142_v44 = vld [vmem:[#allocation5 + $0x238] sm:$0xff]  ;;  %v89_v45 = vld [vmem:[#allocation5 + $0x90] sm:$0xff]  ;;  %v88_v49 = vld [vmem:[#allocation5 + $0x88] sm:$0xff] }
  0x2d   :  { %864 = vmatpush3.msra.mxu1 %v79_v23  ;;  %365 = vmatprep.mubr.f32.mxu1 %v44_v30  ;;  %v157_v46 = vld [vmem:[#allocation5 + $0x2b0] sm:$0xff]  ;;  %v156_v50 = vld [vmem:[#allocation5 + $0x2a8] sm:$0xff]  ;;  %v87_v53 = vld [vmem:[#allocation5 + $0x80] sm:$0xff] }
  0x2e   :  { %865 = vmatprep.subr.mxu1 %v94_v25  ;;  %936 = vmatpush3.msra.mxu0 %v145_v32  ;;  %v73_v47 = vld [vmem:[#allocation5 + $0x10] sm:$0xff]  ;;  %v72_v51 = vld [vmem:[#allocation5 + $0x8] sm:$0xff]  ;;  %v155_v54 = vld [vmem:[#allocation5 + $0x2a0] sm:$0xff] }
  0x2f   :  { %866 = vmatpush3.msra.mxu1 %v78_v27  ;;  %937 = vmatprep.subr.mxu0 %v160_v34  ;;  %v141_v48 = vld [vmem:[#allocation5 + $0x230] sm:$0xff]  ;;  %v140_v52 = vld [vmem:[#allocation5 + $0x228] sm:$0xff]  ;;  %v71_v55 = vld [vmem:[#allocation5] sm:$0xff] }
  0x30   :  { %867 = vmatprep.subr.mxu1 %v93_v29  ;;  %938 = vmatpush3.msra.mxu0 %v144_v36  ;;  %v139_v56 = vld [vmem:[#allocation5 + $0x220] sm:$0xff]  ;;  %v134_v58 = vld [vmem:[#allocation5 + $0x1f8] sm:$0xff]  ;;  %v133_v61 = vld [vmem:[#allocation5 + $0x1f0] sm:$0xff] }
  0x31   :  { %868 = vmatpush3.msra.mxu1 %v77_v31  ;;  %939 = vmatprep.subr.mxu0 %v159_v38  ;;  %v43_v57 = vld [vmem:[#allocation2] sm:$0xff]  ;;  %v118_v59 = vld [vmem:[#allocation5 + $0x178] sm:$0xff]  ;;  %v117_v63 = vld [vmem:[#allocation5 + $0x170] sm:$0xff] }
  0x32   :  { %869 = vmatprep.subr.mxu1 %v92_v33  ;;  %940 = vmatpush3.msra.mxu0 %v143_v40  ;;  %v154_v60 = vld [vmem:[#allocation5 + $0x298] sm:$0xff]  ;;  %v153_v0 = vld [vmem:[#allocation5 + $0x290] sm:$0xff]  ;;  %v132_v1 = vld [vmem:[#allocation5 + $0x1e8] sm:$0xff] }
  0x33   :  { %870 = vmatpush3.msra.mxu1 %v76_v35  ;;  %941 = vmatprep.subr.mxu0 %v158_v42  ;;  %v138_v62 = vld [vmem:[#allocation5 + $0x218] sm:$0xff]  ;;  %v137_v2 = vld [vmem:[#allocation5 + $0x210] sm:$0xff]  ;;  %v116_v3 = vld [vmem:[#allocation5 + $0x168] sm:$0xff] }
  0x34   :  { %871 = vmatprep.subr.mxu1 %v91_v37  ;;  %942 = vmatpush3.msra.mxu0 %v142_v44  ;;  %v152_v4 = vld [vmem:[#allocation5 + $0x288] sm:$0xff]  ;;  %v131_v5 = vld [vmem:[#allocation5 + $0x1e0] sm:$0xff]  ;;  %v130_v9 = vld [vmem:[#allocation5 + $0x1d8] sm:$0xff] }
  0x35   :  { %872 = vmatpush3.msra.mxu1 %v75_v39  ;;  %943 = vmatprep.subr.mxu0 %v157_v46  ;;  %v136_v6 = vld [vmem:[#allocation5 + $0x208] sm:$0xff]  ;;  %v115_v7 = vld [vmem:[#allocation5 + $0x160] sm:$0xff]  ;;  %v114_v11 = vld [vmem:[#allocation5 + $0x158] sm:$0xff] }
  0x36   :  { %873 = vmatprep.subr.mxu1 %v90_v41  ;;  %944 = vmatpush3.msra.mxu0 %v141_v48  ;;  %v151_v8 = vld [vmem:[#allocation5 + $0x280] sm:$0xff]  ;;  %v48_v12 = vld [vmem:[#allocation2 + $0x28] sm:$0xff]  ;;  %v129_v13 = vld [vmem:[#allocation5 + $0x1d0] sm:$0xff] }
  0x37   :  { %874 = vmatpush3.msra.mxu1 %v74_v43  ;;  %945 = vmatprep.subr.mxu0 %v156_v50  ;;  %v135_v10 = vld [vmem:[#allocation5 + $0x200] sm:$0xff]  ;;  %v230_v14 = vld [vmem:[#allocation5 + $0x4f8] sm:$0xff]  ;;  %v113_v15 = vld [vmem:[#allocation5 + $0x150] sm:$0xff] }
  0x38   :  { %875 = vmatprep.subr.mxu1 %v89_v45  ;;  %946 = vmatpush3.msra.mxu0 %v140_v52  ;;  %v47_v16 = vld [vmem:[#allocation2 + $0x20] sm:$0xff]  ;;  %v128_v17 = vld [vmem:[#allocation5 + $0x1c8] sm:$0xff]  ;;  %v214_v18 = vld [vmem:[#allocation5 + $0x478] sm:$0xff] }
  0x39   :  { %876 = vmatpush3.msra.mxu1 %v73_v47  ;;  %947 = vmatprep.subr.mxu0 %v155_v54  ;;  %v112_v19 = vld [vmem:[#allocation5 + $0x148] sm:$0xff]  ;;  %v229_v20 = vld [vmem:[#allocation5 + $0x4f0] sm:$0xff]  ;;  %v127_v21 = vld [vmem:[#allocation5 + $0x1c0] sm:$0xff] }
  0x3a   :  { %877 = vmatprep.subr.mxu1 %v88_v49  ;;  %948 = vmatpush3.msra.mxu0 %v139_v56  ;;  %v213_v22 = vld [vmem:[#allocation5 + $0x470] sm:$0xff]  ;;  %v111_v23 = vld [vmem:[#allocation5 + $0x140] sm:$0xff]  ;;  %v228_v24 = vld [vmem:[#allocation5 + $0x4e8] sm:$0xff] }
  0x3b   :  { %878 = vmatpush3.msra.mxu1 %v72_v51  ;;  %949 = vmatprep.subr.mxu0 %v154_v60  ;;  %v126_v25 = vld [vmem:[#allocation5 + $0x1b8] sm:$0xff]  ;;  %v212_v26 = vld [vmem:[#allocation5 + $0x468] sm:$0xff]  ;;  %v125_v29 = vld [vmem:[#allocation5 + $0x1b0] sm:$0xff] }
  0x3c   :  { %879 = vmatprep.subr.mxu1 %v87_v53  ;;  %950 = vmatpush3.msra.mxu0 %v138_v62  ;;  %v110_v27 = vld [vmem:[#allocation5 + $0x138] sm:$0xff]  ;;  %v227_v30 = vld [vmem:[#allocation5 + $0x4e0] sm:$0xff]  ;;  %v109_v31 = vld [vmem:[#allocation5 + $0x130] sm:$0xff] }
  0x3d   :  { %880 = vmatpush3.msra.mxu1 %v71_v55  ;;  %951 = vmatprep.subr.mxu0 %v153_v0  ;;  %v58_v28 = vld [vmem:[#allocation2 + $0x78] sm:$0xff]  ;;  %v211_v32 = vld [vmem:[#allocation5 + $0x460] sm:$0xff]  ;;  %v124_v33 = vld [vmem:[#allocation5 + $0x1a8] sm:$0xff] }
  0x3e   :  { %366 = vmatmul.mubr.f32.vlgmr.msra.gmra.mxu1 %v43_v57  ;;  %887 = vmatprep.subr.mxu1 %v134_v58  ;;  %v57_v34 = vld [vmem:[#allocation2 + $0x70] sm:$0xff]  ;;  %v108_v35 = vld [vmem:[#allocation5 + $0x128] sm:$0xff]  ;;  %v226_v36 = vld [vmem:[#allocation5 + $0x4d8] sm:$0xff] }
  0x3f   :  { %888 = vmatpush3.msra.mxu1 %v118_v59  ;;  %952 = vmatpush3.msra.mxu0 %v137_v2  ;;  %v123_v37 = vld [vmem:[#allocation5 + $0x1a0] sm:$0xff]  ;;  %v210_v38 = vld [vmem:[#allocation5 + $0x458] sm:$0xff]  ;;  %v225_v40 = vld [vmem:[#allocation5 + $0x4d0] sm:$0xff] }
  0x40   :  { %889 = vmatprep.subr.mxu1 %v133_v61  ;;  %953 = vmatprep.subr.mxu0 %v152_v4  ;;  %v107_v39 = vld [vmem:[#allocation5 + $0x120] sm:$0xff]  ;;  %v122_v41 = vld [vmem:[#allocation5 + $0x198] sm:$0xff]  ;;  %v209_v44 = vld [vmem:[#allocation5 + $0x450] sm:$0xff] }
  0x41   :  { %890 = vmatpush3.msra.mxu1 %v117_v63  ;;  %954 = vmatpush3.msra.mxu0 %v136_v6  ;;  %v46_v42 = vld [vmem:[#allocation2 + $0x18] sm:$0xff]  ;;  %v121_v45 = vld [vmem:[#allocation5 + $0x190] sm:$0xff]  ;;  %v224_v46 = vld [vmem:[#allocation5 + $0x4c8] sm:$0xff] }
  0x42   :  { %891 = vmatprep.subr.mxu1 %v132_v1  ;;  %955 = vmatprep.subr.mxu0 %v151_v8  ;;  %v106_v43 = vld [vmem:[#allocation5 + $0x118] sm:$0xff]  ;;  %v105_v47 = vld [vmem:[#allocation5 + $0x110] sm:$0xff]  ;;  %v208_v48 = vld [vmem:[#allocation5 + $0x448] sm:$0xff] }
  0x43   :  { %892 = vmatpush3.msra.mxu1 %v116_v3  ;;  %956 = vmatpush3.msra.mxu0 %v135_v10  ;;  %v120_v49 = vld [vmem:[#allocation5 + $0x188] sm:$0xff]  ;;  %v223_v50 = vld [vmem:[#allocation5 + $0x4c0] sm:$0xff]  ;;  %v222_v54 = vld [vmem:[#allocation5 + $0x4b8] sm:$0xff] }
  0x44   :  { %893 = vmatprep.subr.mxu1 %v131_v5  ;;  %515 = vmatprep.mubr.f32.mxu0 %v48_v12  ;;  %v104_v51 = vld [vmem:[#allocation5 + $0x108] sm:$0xff]  ;;  %v207_v52 = vld [vmem:[#allocation5 + $0x440] sm:$0xff]  ;;  %v62_v56 = vld [vmem:[#allocation2 + $0x98] sm:$0xff] }
  0x45   :  { %894 = vmatpush3.msra.mxu1 %v115_v7  ;;  %1001 = vmatprep.subr.mxu0 %v230_v14  ;;  %v119_v53 = vld [vmem:[#allocation5 + $0x180] sm:$0xff]  ;;  %v45_v57 = vld [vmem:[#allocation2 + $0x10] sm:$0xff]  ;;  %v198_v58 = vld [vmem:[#allocation5 + $0x3f8] sm:$0xff] }
  0x46   :  { %895 = vmatprep.subr.mxu1 %v130_v9  ;;  %516 = vmatmul.mubr.f32.vlgmr.msra.gmra.mxu0 %v47_v16  ;;  %v103_v55 = vld [vmem:[#allocation5 + $0x100] sm:$0xff]  ;;  %v182_v59 = vld [vmem:[#allocation5 + $0x378] sm:$0xff]  ;;  %v60_v60 = vld [vmem:[#allocation2 + $0x88] sm:$0xff] }
  0x47   :  { %896 = vmatpush3.msra.mxu1 %v114_v11  ;;  %1002 = vmatpush3.msra.mxu0 %v214_v18  ;;  %v197_v61 = vld [vmem:[#allocation5 + $0x3f0] sm:$0xff]  ;;  %v206_v62 = vld [vmem:[#allocation5 + $0x438] sm:$0xff]  ;;  %v59_v1 = vld [vmem:[#allocation2 + $0x80] sm:$0xff] }
  0x48   :  { %897 = vmatprep.subr.mxu1 %v129_v13  ;;  %1003 = vmatprep.subr.mxu0 %v229_v20  ;;  %v181_v63 = vld [vmem:[#allocation5 + $0x370] sm:$0xff]  ;;  %v196_v2 = vld [vmem:[#allocation5 + $0x3e8] sm:$0xff]  ;;  %v195_v5 = vld [vmem:[#allocation5 + $0x3e0] sm:$0xff] }
  0x49   :  { %898 = vmatpush3.msra.mxu1 %v113_v15  ;;  %1004 = vmatpush3.msra.mxu0 %v213_v22  ;;  %v61_v0 = vld [vmem:[#allocation2 + $0x90] sm:$0xff]  ;;  %v180_v3 = vld [vmem:[#allocation5 + $0x368] sm:$0xff]  ;;  %v179_v7 = vld [vmem:[#allocation5 + $0x360] sm:$0xff] }
  0x4a   :  { %899 = vmatprep.subr.mxu1 %v128_v17  ;;  %1005 = vmatprep.subr.mxu0 %v228_v24  ;;  %v221_v4 = vld [vmem:[#allocation5 + $0x4b0] sm:$0xff]  ;;  %v220_v8 = vld [vmem:[#allocation5 + $0x4a8] sm:$0xff]  ;;  %v194_v9 = vld [vmem:[#allocation5 + $0x3d8] sm:$0xff] }
  0x4b   :  { %900 = vmatpush3.msra.mxu1 %v112_v19  ;;  %1006 = vmatpush3.msra.mxu0 %v212_v26  ;;  %v205_v6 = vld [vmem:[#allocation5 + $0x430] sm:$0xff]  ;;  %v204_v10 = vld [vmem:[#allocation5 + $0x428] sm:$0xff]  ;;  %v178_v11 = vld [vmem:[#allocation5 + $0x358] sm:$0xff] }
  0x4c   :  { %901 = vmatprep.subr.mxu1 %v127_v21  ;;  %370 = vmatprep.mubr.f32.mxu1 %v58_v28  ;;  %v219_v12 = vld [vmem:[#allocation5 + $0x4a0] sm:$0xff]  ;;  %v193_v13 = vld [vmem:[#allocation5 + $0x3d0] sm:$0xff]  ;;  %v218_v16 = vld [vmem:[#allocation5 + $0x498] sm:$0xff] }
  0x4d   :  { %902 = vmatpush3.msra.mxu1 %v111_v23  ;;  %1007 = vmatprep.subr.mxu0 %v227_v30  ;;  %v203_v14 = vld [vmem:[#allocation5 + $0x420] sm:$0xff]  ;;  %v177_v15 = vld [vmem:[#allocation5 + $0x350] sm:$0xff]  ;;  %v192_v17 = vld [vmem:[#allocation5 + $0x3c8] sm:$0xff] }
  0x4e   :  { %903 = vmatprep.subr.mxu1 %v126_v25  ;;  %1008 = vmatpush3.msra.mxu0 %v211_v32  ;;  %v202_v18 = vld [vmem:[#allocation5 + $0x418] sm:$0xff]  ;;  %v176_v19 = vld [vmem:[#allocation5 + $0x348] sm:$0xff]  ;;  %v217_v20 = vld [vmem:[#allocation5 + $0x490] sm:$0xff] }
  0x4f   :  { %904 = vmatpush3.msra.mxu1 %v110_v27  ;;  %1009 = vmatprep.subr.mxu0 %v226_v36  ;;  %v191_v21 = vld [vmem:[#allocation5 + $0x3c0] sm:$0xff]  ;;  %v201_v22 = vld [vmem:[#allocation5 + $0x410] sm:$0xff]  ;;  %v216_v24 = vld [vmem:[#allocation5 + $0x488] sm:$0xff] }
  0x50   :  { %905 = vmatprep.subr.mxu1 %v125_v29  ;;  %371 = vmatmul.mubr.f32.gmra.mxu1 %v57_v34  ;;  %v175_v23 = vld [vmem:[#allocation5 + $0x340] sm:$0xff]  ;;  %v190_v25 = vld [vmem:[#allocation5 + $0x3b8] sm:$0xff]  ;;  %v200_v26 = vld [vmem:[#allocation5 + $0x408] sm:$0xff] }
  0x51   :  { %906 = vmatpush3.msra.mxu1 %v109_v31  ;;  %1010 = vmatpush3.msra.mxu0 %v210_v38  ;;  %v174_v27 = vld [vmem:[#allocation5 + $0x338] sm:$0xff]  ;;  %v215_v28 = vld [vmem:[#allocation5 + $0x480] sm:$0xff]  ;;  %v189_v29 = vld [vmem:[#allocation5 + $0x3b0] sm:$0xff]  ;;  %v1157_v38 = vmov 0.0  }
  0x52   :  { %907 = vmatprep.subr.mxu1 %v124_v33  ;;  %1011 = vmatprep.subr.mxu0 %v225_v40  ;;  %v199_v30 = vld [vmem:[#allocation5 + $0x400] sm:$0xff]  ;;  %v173_v31 = vld [vmem:[#allocation5 + $0x330] sm:$0xff]  ;;  %v52_v32 = vld [vmem:[#allocation2 + $0x48] sm:$0xff] }
  0x53   :  { %908 = vmatpush3.msra.mxu1 %v108_v35  ;;  %440 = vmatprep.mubr.f32.mxu1 %v46_v42  ;;  %v188_v33 = vld [vmem:[#allocation5 + $0x3a8] sm:$0xff]  ;;  %v51_v35 = vld [vmem:[#allocation2 + $0x40] sm:$0xff]  ;;  %v278_v36 = vld [vmem:[#allocation5 + $0x678] sm:$0xff] }
  0x54   :  { %909 = vmatprep.subr.mxu1 %v123_v37  ;;  %1012 = vmatpush3.msra.mxu0 %v209_v44  ;;  %v172_v34 = vld [vmem:[#allocation5 + $0x328] sm:$0xff]  ;;  %v187_v37 = vld [vmem:[#allocation5 + $0x3a0] sm:$0xff]  ;;  %v277_v40 = vld [vmem:[#allocation5 + $0x670] sm:$0xff] }
  0x55   :  { %910 = vmatpush3.msra.mxu1 %v107_v39  ;;  %1013 = vmatprep.subr.mxu0 %v224_v46  ;;  %v171_v39 = vld [vmem:[#allocation5 + $0x320] sm:$0xff]  ;;  %v170_v42 = vld [vmem:[#allocation5 + $0x318] sm:$0xff]  ;;  %v185_v44 = vld [vmem:[#allocation5 + $0x390] sm:$0xff] }
  0x56   :  { %911 = vmatprep.subr.mxu1 %v122_v41  ;;  %1014 = vmatpush3.msra.mxu0 %v208_v48  ;;  %v186_v41 = vld [vmem:[#allocation5 + $0x398] sm:$0xff]  ;;  %v275_v46 = vld [vmem:[#allocation5 + $0x660] sm:$0xff]  ;;  %v168_v48 = vld [vmem:[#allocation5 + $0x308] sm:$0xff] }
  0x57   :  { %912 = vmatpush3.msra.mxu1 %v106_v43  ;;  %1015 = vmatprep.subr.mxu0 %v223_v50  ;;  %v276_v43 = vld [vmem:[#allocation5 + $0x668] sm:$0xff]  ;;  %v183_v50 = vld [vmem:[#allocation5 + $0x380] sm:$0xff] }
  0x58   :  { %913 = vmatprep.subr.mxu1 %v121_v45  ;;  %1016 = vmatpush3.msra.mxu0 %v207_v52  ;;  %v169_v45 = vld [vmem:[#allocation5 + $0x310] sm:$0xff]  ;;  %v50_v52 = vld [vmem:[#allocation2 + $0x38] sm:$0xff] }
  0x59   :  { %914 = vmatpush3.msra.mxu1 %v105_v47  ;;  %1017 = vmatprep.subr.mxu0 %v222_v54  ;;  %v184_v47 = vld [vmem:[#allocation5 + $0x388] sm:$0xff]  ;;  %v49_v54 = vld [vmem:[#allocation2 + $0x30] sm:$0xff] }
  0x5a   :  { %915 = vmatprep.subr.mxu1 %v120_v49  ;;  %520 = vmatprep.mubr.f32.mxu0 %v62_v56  ;;  %v274_v49 = vld [vmem:[#allocation5 + $0x658] sm:$0xff] }
  0x5b   :  { %916 = vmatpush3.msra.mxu1 %v104_v51  ;;  %1018 = vmatpush3.msra.mxu0 %v206_v62  ;;  %v167_v51 = vld [vmem:[#allocation5 + $0x300] sm:$0xff]  ;;  %v246_v56 = vld [vmem:[#allocation5 + $0x578] sm:$0xff] }
  0x5c   :  { %917 = vmatprep.subr.mxu1 %v119_v53  ;;  %521 = vmatmul.mubr.f32.gmra.mxu0 %v61_v0  ;;  %v273_v53 = vld [vmem:[#allocation5 + $0x650] sm:$0xff]  ;;  %v63_v62 = vld [vmem:[#allocation2 + $0xa0] sm:$0xff]  ;;  %v66_v0 = vld [vmem:[#allocation2 + $0xb8] sm:$0xff] }
  0x5d   :  { %918 = vmatpush3.msra.mxu1 %v103_v55  ;;  %1019 = vmatprep.subr.mxu0 %v221_v4  ;;  %v262_v55 = vld [vmem:[#allocation5 + $0x5f8] sm:$0xff]  ;;  %v259_v4 = vld [vmem:[#allocation5 + $0x5e0] sm:$0xff] }
  0x5e   :  { %441 = vmatmul.mubr.f32.vlgmr.msra.gmra.mxu1 %v45_v57  ;;  %963 = vmatprep.subr.mxu1 %v198_v58  ;;  %v272_v57 = vld [vmem:[#allocation5 + $0x648] sm:$0xff]  ;;  %v261_v58 = vld [vmem:[#allocation5 + $0x5f0] sm:$0xff] }
  0x5f   :  { %964 = vmatpush3.msra.mxu1 %v182_v59  ;;  %445 = vmatprep.mubr.f32.mxu1 %v60_v60  ;;  %v64_v59 = vld [vmem:[#allocation2 + $0xa8] sm:$0xff]  ;;  %v245_v60 = vld [vmem:[#allocation5 + $0x570] sm:$0xff] }
  0x60   :  { %965 = vmatprep.subr.mxu1 %v197_v61  ;;  %1020 = vmatpush3.msra.mxu0 %v205_v6  ;;  %v271_v61 = vld [vmem:[#allocation5 + $0x640] sm:$0xff]  ;;  %v269_v6 = vld [vmem:[#allocation5 + $0x630] sm:$0xff] }
  0x61   :  { %966 = vmatpush3.msra.mxu1 %v181_v63  ;;  %1021 = vmatprep.subr.mxu0 %v220_v8  ;;  %v260_v63 = vld [vmem:[#allocation5 + $0x5e8] sm:$0xff]  ;;  %v242_v8 = vld [vmem:[#allocation5 + $0x558] sm:$0xff] }
  0x62   :  { %446 = vmatmul.mubr.f32.gmra.mxu1 %v59_v1  ;;  %967 = vmatprep.subr.mxu1 %v196_v2  ;;  %v244_v1 = vld [vmem:[#allocation5 + $0x568] sm:$0xff]  ;;  %v270_v2 = vld [vmem:[#allocation5 + $0x638] sm:$0xff] }
  0x63   :  { %968 = vmatpush3.msra.mxu1 %v180_v3  ;;  %1022 = vmatpush3.msra.mxu0 %v204_v10  ;;  %v65_v3 = vld [vmem:[#allocation2 + $0xb0] sm:$0xff] }
  0x64   :  { %969 = vmatprep.subr.mxu1 %v195_v5  ;;  %1023 = vmatprep.subr.mxu0 %v219_v12  ;;  %v243_v5 = vld [vmem:[#allocation5 + $0x560] sm:$0xff]  ;;  %v257_v10 = vld [vmem:[#allocation5 + $0x5d0] sm:$0xff] }
  0x65   :  { %970 = vmatpush3.msra.mxu1 %v179_v7  ;;  %1024 = vmatpush3.msra.mxu0 %v203_v14  ;;  %v258_v7 = vld [vmem:[#allocation5 + $0x5d8] sm:$0xff]  ;;  %v267_v12 = vld [vmem:[#allocation5 + $0x620] sm:$0xff]  ;;  %v240_v14 = vld [vmem:[#allocation5 + $0x548] sm:$0xff] }
  0x66   :  { %971 = vmatprep.subr.mxu1 %v194_v9  ;;  %1025 = vmatprep.subr.mxu0 %v218_v16  ;;  %v268_v9 = vld [vmem:[#allocation5 + $0x628] sm:$0xff]  ;;  %v255_v16 = vld [vmem:[#allocation5 + $0x5c0] sm:$0xff] }
  0x67   :  { %972 = vmatpush3.msra.mxu1 %v178_v11  ;;  %1026 = vmatpush3.msra.mxu0 %v202_v18  ;;  %v241_v11 = vld [vmem:[#allocation5 + $0x550] sm:$0xff] }
  0x68   :  { %973 = vmatprep.subr.mxu1 %v193_v13  ;;  %1027 = vmatprep.subr.mxu0 %v217_v20  ;;  %v256_v13 = vld [vmem:[#allocation5 + $0x5c8] sm:$0xff]  ;;  %v265_v18 = vld [vmem:[#allocation5 + $0x610] sm:$0xff]  ;;  %v238_v20 = vld [vmem:[#allocation5 + $0x538] sm:$0xff] }
  0x69   :  { %974 = vmatpush3.msra.mxu1 %v177_v15  ;;  %1028 = vmatpush3.msra.mxu0 %v201_v22  ;;  %v266_v15 = vld [vmem:[#allocation5 + $0x618] sm:$0xff]  ;;  %v253_v22 = vld [vmem:[#allocation5 + $0x5b0] sm:$0xff] }
  0x6a   :  { %975 = vmatprep.subr.mxu1 %v192_v17  ;;  %1029 = vmatprep.subr.mxu0 %v216_v24  ;;  %v239_v17 = vld [vmem:[#allocation5 + $0x540] sm:$0xff] }
  0x6b   :  { %976 = vmatpush3.msra.mxu1 %v176_v19  ;;  %1030 = vmatpush3.msra.mxu0 %v200_v26  ;;  %v254_v19 = vld [vmem:[#allocation5 + $0x5b8] sm:$0xff]  ;;  %v263_v24 = vld [vmem:[#allocation5 + $0x600] sm:$0xff]  ;;  %v236_v26 = vld [vmem:[#allocation5 + $0x528] sm:$0xff] }
  0x6c   :  { %977 = vmatprep.subr.mxu1 %v191_v21  ;;  %1031 = vmatprep.subr.mxu0 %v215_v28  ;;  %v264_v21 = vld [vmem:[#allocation5 + $0x608] sm:$0xff]  ;;  %v251_v28 = vld [vmem:[#allocation5 + $0x5a0] sm:$0xff] }
  0x6d   :  { %978 = vmatpush3.msra.mxu1 %v175_v23  ;;  %1032 = vmatpush3.msra.mxu0 %v199_v30  ;;  %v237_v23 = vld [vmem:[#allocation5 + $0x530] sm:$0xff] }
  0x6e   :  { %979 = vmatprep.subr.mxu1 %v190_v25  ;;  %665 = vmatprep.mubr.f32.mxu0 %v52_v32  ;;  %v252_v25 = vld [vmem:[#allocation5 + $0x5a8] sm:$0xff]  ;;  %v285_v30 = vld [vmem:[#allocation5 + $0x6b0] sm:$0xff]  ;;  %v234_v32 = vld [vmem:[#allocation5 + $0x518] sm:$0xff] }
  0x6f   :  { %980 = vmatpush3.msra.mxu1 %v174_v27  ;;  %751 = vmatprep.subr.mxu0 %v1157_v38  ;;  %v286_v27 = vld [vmem:[#allocation5 + $0x6b8] sm:$0xff] }
  0x70   :  { %981 = vmatprep.subr.mxu1 %v189_v29  ;;  %666 = vmatmul.mubr.f32.vlgmr.msra.gmra.mxu0 %v51_v35  ;;  %v235_v29 = vld [vmem:[#allocation5 + $0x520] sm:$0xff]  ;;  %v233_v35 = vld [vmem:[#allocation5 + $0x510] sm:$0xff] }
  0x71   :  { %982 = vmatpush3.msra.mxu1 %v173_v31  ;;  %752 = vmatpush1.msra.mxu0 %v278_v36  ;;  %v250_v31 = vld [vmem:[#allocation5 + $0x598] sm:$0xff]  ;;  %v283_v36 = vld [vmem:[#allocation5 + $0x6a0] sm:$0xff] }
  0x72   :  { %983 = vmatprep.subr.mxu1 %v188_v33  ;;  %753 = vmatprep.subr.mxu0 %v1157_v38  ;;  %v284_v33 = vld [vmem:[#allocation5 + $0x6a8] sm:$0xff] }
  0x73   :  { %984 = vmatpush3.msra.mxu1 %v172_v34  ;;  %754 = vmatpush1.msra.mxu0 %v277_v40  ;;  %v249_v34 = vld [vmem:[#allocation5 + $0x590] sm:$0xff]  ;;  %v282_v40 = vld [vmem:[#allocation5 + $0x698] sm:$0xff] }
  0x74   :  { %985 = vmatprep.subr.mxu1 %v187_v37  ;;  %755 = vmatprep.subr.mxu0 %v1157_v38  ;;  %v248_v37 = vld [vmem:[#allocation5 + $0x588] sm:$0xff] }
  0x75   :  { %986 = vmatpush3.msra.mxu1 %v171_v39  ;;  %756 = vmatpush1.msra.mxu0 %v276_v43  ;;  %v232_v39 = vld [vmem:[#allocation5 + $0x508] sm:$0xff]  ;;  %v54_v43 = vld [vmem:[#allocation2 + $0x58] sm:$0xff] }
  0x76   :  { %987 = vmatprep.subr.mxu1 %v186_v41  ;;  %757 = vmatprep.subr.mxu0 %v1157_v38  ;;  %v247_v41 = vld [vmem:[#allocation5 + $0x580] sm:$0xff] }
  0x77   :  { %988 = vmatpush3.msra.mxu1 %v170_v42  ;;  %758 = vmatpush1.msra.mxu0 %v275_v46  ;;  %v231_v42 = vld [vmem:[#allocation5 + $0x500] sm:$0xff]  ;;  %v280_v46 = vld [vmem:[#allocation5 + $0x688] sm:$0xff] }
  0x78   :  { %989 = vmatprep.subr.mxu1 %v185_v44  ;;  %759 = vmatprep.subr.mxu0 %v1157_v38  ;;  %v281_v44 = vld [vmem:[#allocation5 + $0x690] sm:$0xff] }
  0x79   :  { %990 = vmatpush3.msra.mxu1 %v169_v45  ;;  %760 = vmatpush1.msra.mxu0 %v274_v49  ;;  %v53_v45 = vld [vmem:[#allocation2 + $0x50] sm:$0xff]  ;;  %v279_v49 = vld [vmem:[#allocation5 + $0x680] sm:$0xff] }
  0x7a   :  { %991 = vmatprep.subr.mxu1 %v184_v47  ;;  %761 = vmatprep.subr.mxu0 %v1157_v38  ;;  %v68_v47 = vld [vmem:[#allocation2 + $0xc8] sm:$0xff] }
  0x7b   :  { %992 = vmatpush3.msra.mxu1 %v168_v48  ;;  %590 = vmatprep.mubr.f32.mxu1 %v50_v52  ;;  %v56_v48 = vld [vmem:[#allocation2 + $0x68] sm:$0xff]  ;;  %v70_v52 = vld [vmem:[#allocation2 + $0xd8] sm:$0xff] }
  0x7c   :  { %993 = vmatprep.subr.mxu1 %v183_v50  ;;  %762 = vmatpush1.msra.mxu0 %v273_v53  ;;  %v67_v50 = vld [vmem:[#allocation2 + $0xc0] sm:$0xff]  ;;  %v69_v53 = vld [vmem:[#allocation2 + $0xd0] sm:$0xff] }
  0x7d   :  { %994 = vmatpush3.msra.mxu1 %v167_v51  ;;  %763 = vmatprep.subr.mxu0 %v1157_v38  ;;  %v55_v51 = vld [vmem:[#allocation2 + $0x60] sm:$0xff] }
  0x7e   :  { %591 = vmatmul.mubr.f32.vlgmr.msra.gmra.mxu1 %v49_v54  ;;  %1039 = vmatprep.subr.mxu1 %v262_v55 }
  0x7f   :  { %1040 = vmatpush3.msra.mxu1 %v246_v56  ;;  %764 = vmatpush1.msra.mxu0 %v272_v57 }
  0x80   :  { %1041 = vmatprep.subr.mxu1 %v261_v58  ;;  %765 = vmatprep.subr.mxu0 %v1157_v38 }
  0x81   :  { %595 = vmatprep.mubr.f32.mxu1 %v64_v59  ;;  %1042 = vmatpush3.msra.mxu1 %v245_v60 }
  0x82   :  { %766 = vmatpush1.msra.mxu0 %v271_v61  ;;  %596 = vmatmul.mubr.f32.gmra.mxu1 %v63_v62 }
  0x83   :  { %1043 = vmatprep.subr.mxu1 %v260_v63  ;;  %767 = vmatprep.subr.mxu0 %v1157_v38 }
  0x84   :  { %670 = vmatprep.mubr.f32.mxu0 %v66_v0  ;;  %1044 = vmatpush3.msra.mxu1 %v244_v1 }
  0x85   :  { %768 = vmatpush1.msra.mxu0 %v270_v2  ;;  %1045 = vmatprep.subr.mxu1 %v259_v4  ;;  %v846_v2 = vld [vmem:[%s1223_s2] ss:$0 sm:$0xff]  ;;  %s1158_s2 = smov [#allocation7]  }
  0x86   :  { %671 = vmatmul.mubr.f32.gmra.mxu0 %v65_v3  ;;  %769 = vmatprep.subr.mxu0 %v1157_v38  ;;  %s833_s26 = sshll.u32 %s1158_s2, 4  ;;  %s834_s26 = int_to_ptr.vmem [resolvable:$true] %s833_s26 }
  0x87   :  { %1046 = vmatpush3.msra.mxu1 %v243_v5  ;;  %770 = vmatpush1.msra.mxu0 %v269_v6  ;;  %s1125_s27 = scalar_lea.vmem %s834_s26, 256  ;;  %p1130_p11 = scmp.lt.s32.totalorder %s834_s26, %s834_s26 }
  0x88   :  { %1047 = vmatprep.subr.mxu1 %v258_v7  ;;  %771 = vmatprep.subr.mxu0 %v1157_v38  ;;  %p1126_p10 = scmp.ne.s32.totalorder %s834_s26, %s1125_s27  ;;  %p1131_p12 = scmp.lt.s32.totalorder %s1125_s27, %s1125_s27 }
  0x89   :  { %1048 = vmatpush3.msra.mxu1 %v242_v8  ;;  %772 = vmatpush1.msra.mxu0 %v268_v9 }
  0x8a   :  { %1049 = vmatprep.subr.mxu1 %v257_v10  ;;  %773 = vmatprep.subr.mxu0 %v1157_v38  ;;  %p1132_p13 = por %p1131_p12, %p1130_p11 }
  0x8b   :  { %1050 = vmatpush3.msra.mxu1 %v241_v11  ;;  %774 = vmatpush1.msra.mxu0 %v267_v12 }
  0x8c   :  { %1051 = vmatprep.subr.mxu1 %v256_v13  ;;  %775 = vmatprep.subr.mxu0 %v1157_v38  ;;  %p1133_p0 = pnand %p1132_p13, %p1126_p10 }
  0x8d   :  { %1052 = vmatpush3.msra.mxu1 %v240_v14  ;;  %776 = vmatpush1.msra.mxu0 %v266_v15 }
  0x8e   :  { %1053 = vmatprep.subr.mxu1 %v255_v16  ;;  %777 = vmatprep.subr.mxu0 %v1157_v38 }
  0x8f   :  { %1054 = vmatpush3.msra.mxu1 %v239_v17  ;;  %778 = vmatpush1.msra.mxu0 %v265_v18 }
  0x90   :  { %1055 = vmatprep.subr.mxu1 %v254_v19  ;;  %779 = vmatprep.subr.mxu0 %v1157_v38 }
  0x91   :  { %1056 = vmatpush3.msra.mxu1 %v238_v20  ;;  %780 = vmatpush1.msra.mxu0 %v264_v21 }
  0x92   :  { %1057 = vmatprep.subr.mxu1 %v253_v22  ;;  %781 = vmatprep.subr.mxu0 %v1157_v38 }
  0x93   :  { %1058 = vmatpush3.msra.mxu1 %v237_v23  ;;  %782 = vmatpush1.msra.mxu0 %v263_v24 }
  0x94   :  { %1059 = vmatprep.subr.mxu1 %v252_v25  ;;  %799 = vmatprep.subr.mxu0 %v1157_v38 }
  0x95   :  { %1060 = vmatpush3.msra.mxu1 %v236_v26  ;;  %800 = vmatpush2.msra.mxu0 %v286_v27 }
  0x96   :  { %1061 = vmatprep.subr.mxu1 %v251_v28  ;;  %801 = vmatprep.subr.mxu0 %v1157_v38 }
  0x97   :  { %1062 = vmatpush3.msra.mxu1 %v235_v29  ;;  %802 = vmatpush2.msra.mxu0 %v285_v30 }
  0x98   :  { %1063 = vmatprep.subr.mxu1 %v250_v31  ;;  %803 = vmatprep.subr.mxu0 %v1157_v38 }
  0x99   :  { %1064 = vmatpush3.msra.mxu1 %v234_v32  ;;  %804 = vmatpush2.msra.mxu0 %v284_v33 }
  0x9a   :  { %1065 = vmatprep.subr.mxu1 %v249_v34  ;;  %805 = vmatprep.subr.mxu0 %v1157_v38 }
  0x9b   :  { %1066 = vmatpush3.msra.mxu1 %v233_v35  ;;  %806 = vmatpush2.msra.mxu0 %v283_v36 }
  0x9c   :  { %1067 = vmatprep.subr.mxu1 %v248_v37  ;;  %807 = vmatprep.subr.mxu0 %v1157_v38 }
  0x9d   :  { %1068 = vmatpush3.msra.mxu1 %v232_v39  ;;  %808 = vmatpush2.msra.mxu0 %v282_v40 }
  0x9e   :  { %1069 = vmatprep.subr.mxu1 %v247_v41  ;;  %809 = vmatprep.subr.mxu0 %v1157_v38 }
  0x9f   :  { %1070 = vmatpush3.msra.mxu1 %v231_v42  ;;  %740 = vmatprep.mubr.f32.mxu1 %v54_v43 }
  0xa0   :  { %810 = vmatpush2.msra.mxu0 %v281_v44  ;;  %741 = vmatmul.mubr.f32.vlgmr.msra.gmra.mxu1 %v53_v45 }
  0xa1   :  { %811 = vmatprep.subr.mxu0 %v1157_v38  ;;  %745 = vmatprep.mubr.f32.mxu1 %v68_v47 }
  0xa2   :  { %812 = vmatpush2.msra.mxu0 %v280_v46  ;;  %847 = vmatprep.mubr.msk.f32.mxu0 %vm294_vm0, %v56_v48 }
  0xa3   :  { %813 = vmatprep.subr.mxu0 %v1157_v38 }
  0xa4   :  { %814 = vmatpush2.msra.mxu0 %v279_v49  ;;  %746 = vmatmul.mubr.f32.gmra.mxu1 %v67_v50 }
  0xa5   :  { %816 = vmatmul.mubr.f32.vlgmr.msra.gmra.mxu0 %v55_v51 }
  0xa6   :  { %848 = vmatprep.mubr.msk.f32.mxu0 %vm294_vm0, %v70_v52 }
  0xa9   :  { %821 = vmatmul.mubr.f32.gmra.mxu0 %v69_v53 }
  0xfe   :  { %v881_v54 = vpop.f32.mrf.mxu1 }
 0x100   :  { %v882_v55 = vpop.f32.mrf.mxu1 }
 0x101   :  { %v883_v1 = vadd.f32 %v882_v55, %v881_v54 }
 0x103   :  { %v368_v7 = vadd.f32 %v883_v1, %v846_v2 }
 0x106   :  { %v957_v60 = vpop.f32.mrf.mxu0 }
 0x108   :  { %v958_v62 = vpop.f32.mrf.mxu0 }
 0x109   :  { %v959_v13 = vadd.f32 %v958_v62, %v957_v60 }
 0x110   :  { %v884_v56 = vpop.f32.mrf.mxu1 }
 0x112   :  { %v885_v57 = vpop.f32.mrf.mxu1 }
 0x113   :  { %v886_v8 = vadd.f32 %v885_v57, %v884_v56 }
 0x115   :  { %v373_v14 = vadd.f32 %v886_v8, %v846_v2 }
 0x11c   :  { %v960_v0 = vpop.f32.mrf.mxu0 }
 0x11e   :  { %v919_v58 = vpop.f32.mrf.mxu1  ;;  %v961_v3 = vpop.f32.mrf.mxu0 }
 0x11f   :  { %v962_v19 = vadd.f32 %v961_v3, %v960_v0 }
 0x120   :  { %v920_v59 = vpop.f32.mrf.mxu1 }
 0x121   :  { %v921_v5 = vadd.f32 %v920_v59, %v919_v58 }
 0x122   :  { %v922_v61 = vpop.f32.mrf.mxu1 }
 0x123   :  { %v443_v10 = vadd.f32 %v921_v5, %v368_v7 }
 0x124   :  { %v923_v63 = vpop.f32.mrf.mxu1 }
 0x125   :  { %v924_v11 = vadd.f32 %v923_v63, %v922_v61  ;;  %v518_v20 = vadd.f32 %v959_v13, %v443_v10 }
 0x127   :  { %v448_v18 = vadd.f32 %v924_v11, %v373_v14 }
 0x129   :  { %v523_v25 = vadd.f32 %v962_v19, %v448_v18 }
 0x130   :  { %v1033_v6 = vpop.f32.mrf.mxu0 }
 0x132   :  { %v1034_v12 = vpop.f32.mrf.mxu0 }
 0x133   :  { %v1035_v26 = vadd.f32 %v1034_v12, %v1033_v6 }
 0x13e   :  { %v995_v38 = vpop.f32.mrf.mxu1 }
 0x140   :  { %v996_v4 = vpop.f32.mrf.mxu1 }
 0x141   :  { %v997_v15 = vadd.f32 %v996_v4, %v995_v38 }
 0x142   :  { %v998_v9 = vpop.f32.mrf.mxu1 }
 0x143   :  { %v593_v21 = vadd.f32 %v997_v15, %v518_v20 }
 0x144   :  { %v999_v16 = vpop.f32.mrf.mxu1 }
 0x145   :  { %v1000_v22 = vadd.f32 %v999_v16, %v998_v9  ;;  %v668_v31 = vadd.f32 %v1035_v26, %v593_v21 }
 0x146   :  { %v1036_v17 = vpop.f32.mrf.mxu0 }
 0x147   :  { %v598_v28 = vadd.f32 %v1000_v22, %v523_v25 }
 0x148   :  { %v1037_v23 = vpop.f32.mrf.mxu0 }
 0x149   :  { %v1038_v29 = vadd.f32 %v1037_v23, %v1036_v17 }
 0x14b   :  { %v673_v37 = vadd.f32 %v1038_v29, %v598_v28 }
 0x160   :  { %v1071_v24 = vpop.f32.mrf.mxu1 }
 0x162   :  { %v1072_v27 = vpop.f32.mrf.mxu1 }
 0x163   :  { %v1073_v30 = vadd.f32 %v1072_v27, %v1071_v24 }
 0x164   :  { %v1074_v32 = vpop.f32.mrf.mxu1 }
 0x165   :  { %v817_v33 = vpop.f32.mrf.mxu0  ;;  %v743_v34 = vadd.f32 %v1073_v30, %v668_v31 }
 0x166   :  { %v1075_v35 = vpop.f32.mrf.mxu1 }
 0x167   :  { %v819_v36 = vpop.f32.mrf.mxu0  ;;  %v818_v39 = vadd.f32 %v817_v33, %v743_v34  ;;  %v1076_v40 = vadd.f32 %v1075_v35, %v1074_v32 }
 0x169   :  { %v822_v41 = vpop.f32.mrf.mxu0  ;;  %826 = vst [vmem:[#allocation7] sm:$0xff] %v818_v39  ;;  %v748_v42 = vadd.f32 %v1076_v40, %v673_v37 }
 0x16b   :  { %v824_v43 = vpop.f32.mrf.mxu0  ;;  %v823_v44 = vadd.f32 %v822_v41, %v748_v42 }
 0x16d   :  { %827 = vst [vmem:[#allocation7 + $0x8] sm:$0xff] %v823_v44 }
 0x16e   :  { %1136 = shalt.err (!%p1133_p0)
}
 0x16f   :  { %839 = dma.vmem_to_hbm [thread:$0]  %s834_s26, 256, %s1224_s3, [#allocation4], %s1155_s22, %s1155_s22, %s1156_s23  }
 0x170   :  { %1149 = dma.done.wait [#allocation4], 256  }
 0x171   :  { %1150 = vsyncadd [#allocation4], 4294967040 }
 0x172   :  { %843 = vsyncpa [#allocation3], 1 }
 0x173   :  { %844 = vsyncpa [#allocation6], 1 }
 0x174   :  { %845 = vsyncpa [#allocation4], 1 }

</bundles_post_ra>
